<compile_context>
chip_gen: v6e
topology: v6e:2x2x1
jax: 0.10.0
libtpu: 0.0.40
codegen_flags: <defaults>
</compile_context>

<pallas_src>
import jax
import jax.numpy as jnp
from jax.experimental import pallas as pl
from jax.experimental.pallas import tpu as pltpu


def _mlp_kernel(xt_ref, p_ref, b2_ref, ot_ref):
    # xt_ref: [1, Bp]  feature on sublane, batch on lanes (lane-dense)
    # p_ref : [H, 3]   col0 = W1[0,:], col1 = b1, col2 = W2[:,0]   (VMEM)
    # b2_ref: [1, 1]   output bias                                  (SMEM)
    # ot_ref: [1, Bp]
    p = p_ref[...]                       # [H, 3]
    w1 = p[:, 0:1]                       # [H, 1]
    b1 = p[:, 1:2]                       # [H, 1]
    w2 = p[:, 2:3]                       # [H, 1]
    b2 = b2_ref[0, 0]                    # scalar from SMEM -> sreg broadcast

    # Layer 1 (K=1 matmul == outer product): VPU multiply + EUP tanh.
    h = jnp.tanh(w1 * xt_ref[...] + b1)                      # [H, Bp]
    # Layer 2 (N=1 matmul == weighted sum): VPU multiply + XLU sublane reduce.
    y = jnp.sum(w2 * h, axis=0, keepdims=True) + b2          # [1, Bp]
    ot_ref[...] = y.astype(ot_ref.dtype)


def pack_params(w1, b1, w2, b2):
    """Pack weights once (per weight update / at init), not per forward call.

    Returns:
      params : [n_hidden, 3] f32 (W1 row, b1, W2 column)
      b2_smem: [1, 1]        f32 (output bias, read as an SMEM scalar)
    """
    params = jnp.stack(
        [w1[0, :], b1[0, :], w2[:, 0]], axis=1
    ).astype(jnp.float32)                                   # [H, 3]
    b2_smem = b2.reshape(1, 1).astype(jnp.float32)          # [1, 1]
    return params, b2_smem


@jax.jit
def mlp_forward(x, params, b2_smem):
    """x: [B, 1] -> [B, 1] (float32). Specialised to the 1 -> H -> 1 MLP.

    All wrapper ops (pad, kernel call, slice, transpose) fuse under this jit.
    """
    B, n_feature = x.shape
    assert n_feature == 1, "kernel specialised for 1->H->1 MLP"

    # Pad batch up to a multiple of 128 so output stores are lane-dense
    # (unmasked vst); padded lanes are sliced off below.
    Bp = ((B + 127) // 128) * 128
    xt = jnp.pad(x.T, ((0, 0), (0, Bp - B)))                # [1, Bp]

    vmem = pltpu.MemorySpace.VMEM
    smem = pltpu.MemorySpace.SMEM
    out_t = pl.pallas_call(
        _mlp_kernel,
        out_shape=jax.ShapeDtypeStruct((1, Bp), x.dtype),
        grid=(),
        in_specs=[
            pl.BlockSpec(xt.shape, lambda: (0, 0), memory_space=vmem),
            pl.BlockSpec(params.shape, lambda: (0, 0), memory_space=vmem),
            pl.BlockSpec(b2_smem.shape, lambda: (0, 0), memory_space=smem),
        ],
        out_specs=pl.BlockSpec((1, Bp), lambda: (0, 0), memory_space=vmem),
        compiler_params=pltpu.CompilerParams(dimension_semantics=()),
    )(xt, params, b2_smem)

    return out_t[:, :B].T                                   # [B, 1]


def init_params(key, n_feature, n_hidden, n_output):
    """Deterministic init mimicking torch.nn.Linear's U(-1/sqrt(fan_in), +)."""
    k1, k2, k3, k4 = jax.random.split(key, 4)
    bound1 = 1.0 / jnp.sqrt(n_feature)
    bound2 = 1.0 / jnp.sqrt(n_hidden)
    w1 = jax.random.uniform(k1, (n_feature, n_hidden), jnp.float32, -bound1, bound1)
    b1 = jax.random.uniform(k2, (1, n_hidden), jnp.float32, -bound1, bound1)
    w2 = jax.random.uniform(k3, (n_hidden, n_output), jnp.float32, -bound2, bound2)
    b2 = jax.random.uniform(k4, (1, n_output), jnp.float32, -bound2, bound2)
    return w1, b1, w2, b2


if __name__ == "__main__":
    n_feature, n_hidden, n_output = 1, 32, 1

    # Same input as the original script: x = torch.arange(0, 2, 0.01).unsqueeze(1)
    x = jnp.arange(0.0, 2.0, 0.01, dtype=jnp.float32).reshape(-1, 1)  # [200, 1]

    key = jax.random.PRNGKey(0)
    w1, b1, w2, b2 = init_params(key, n_feature, n_hidden, n_output)

    # Parameter packing hoisted out of the forward path (done once).
    params, b2_smem = pack_params(w1, b1, w2, b2)

    out = mlp_forward(x, params, b2_smem)
    out = jax.block_until_ready(out)

    # Pure-JAX reference check of the same math.
    ref = jnp.tanh(x @ w1 + b1) @ w2 + b2
    assert out.shape == (x.shape[0], n_output)
    assert jnp.allclose(out, ref, atol=1e-5), "mismatch vs reference"

    print("KERNEL_OK")
</pallas_src>

<mosaic_0001>
module attributes {stable_mosaic.version = 11 : i64} {
  func.func @_mlp_kernel(%arg0: memref<1x256xf32, #tpu.memory_space<vmem>>, %arg1: memref<32x3xf32, #tpu.memory_space<vmem>>, %arg2: memref<1x1xf32, #tpu.memory_space<smem>>, %arg3: memref<1x256xf32, #tpu.memory_space<vmem>>) attributes {dimension_semantics = [], scalar_prefetch = 0 : i64, scratch_operands = 0 : i64, tpu.core_type = #tpu.core_type<tc>} {
    %c0 = arith.constant 0 : index
    %c0_0 = arith.constant 0 : index
    %0 = vector.load %arg1[%c0, %c0_0] : memref<32x3xf32, #tpu.memory_space<vmem>>, vector<32x3xf32>
    %1 = vector.extract_strided_slice %0 {offsets = [0, 0], sizes = [32, 1], strides = [1, 1]} : vector<32x3xf32> to vector<32x1xf32>
    %2 = vector.extract_strided_slice %0 {offsets = [0, 1], sizes = [32, 1], strides = [1, 1]} : vector<32x3xf32> to vector<32x1xf32>
    %3 = vector.extract_strided_slice %0 {offsets = [0, 2], sizes = [32, 1], strides = [1, 1]} : vector<32x3xf32> to vector<32x1xf32>
    %c0_1 = arith.constant 0 : index
    %c0_2 = arith.constant 0 : index
    %4 = memref.load %arg2[%c0_1, %c0_2] : memref<1x1xf32, #tpu.memory_space<smem>>
    %c0_3 = arith.constant 0 : index
    %c0_4 = arith.constant 0 : index
    %5 = vector.load %arg0[%c0_3, %c0_4] : memref<1x256xf32, #tpu.memory_space<vmem>>, vector<1x256xf32>
    %6 = vector.broadcast %1 : vector<32x1xf32> to vector<32x256xf32>
    %7 = vector.broadcast %5 : vector<1x256xf32> to vector<32x256xf32>
    %8 = arith.mulf %6, %7 : vector<32x256xf32>
    %9 = vector.broadcast %2 : vector<32x1xf32> to vector<32x256xf32>
    %10 = arith.addf %8, %9 : vector<32x256xf32>
    %11 = math.tanh %10 : vector<32x256xf32>
    %12 = vector.broadcast %3 : vector<32x1xf32> to vector<32x256xf32>
    %13 = arith.mulf %12, %11 : vector<32x256xf32>
    %cst = arith.constant dense<0.000000e+00> : vector<256xf32>
    %14 = vector.multi_reduction <add>, %13, %cst [0] : vector<32x256xf32> to vector<256xf32>
    %15 = vector.shape_cast %14 : vector<256xf32> to vector<1x256xf32>
    %16 = vector.broadcast %4 : f32 to vector<1x256xf32>
    %17 = arith.addf %15, %16 : vector<1x256xf32>
    %c0_5 = arith.constant 0 : index
    %c0_6 = arith.constant 0 : index
    %18 = vector.load %arg3[%c0_5, %c0_6] : memref<1x256xf32, #tpu.memory_space<vmem>>, vector<1x256xf32>
    tpu.vector_store %arg3[%c0_5, %c0_6], %17 {strides = array<i32>} : memref<1x256xf32, #tpu.memory_space<vmem>>, vector<1x256xf32>,
    return
  }
}

</mosaic_0001>

<bundles_post_ra>
// kernel: mlp_forward.1
= control target key start
LH: loop header
LB: loop body
LE: loop exit
PB: predicated region body
PF: predicated region fallthrough
CT: control target
= control target key end

     0   :  { %v192_v0 = vmov 0   ;;  %v193_v4 = vmov 1   ;;  %v194_v6 = vmov 2   ;;  %v42_v7 = vlaneseq  ;;  %s244_s1 = inlined_call_operand.vmem [shape: f32[32,3], index: 1, kind: input, shape index: {}]   ;;  %s245_s0 = inlined_call_operand.vmem [shape: f32[1,256], index: 0, kind: input, shape index: {}]   ;;  %s246_s2 = inlined_call_operand.<no memory space> [shape: f32[1,1], index: 2, kind: input, shape index: {}]   ;;  %s247_s3 = inlined_call_operand.vmem [shape: f32[1,256], index: 3, kind: output, shape index: {}]  }
   0x1   :  { %169 = vset.pattern.permute.xlu1 %v192_v0  ;;  %168 = vset.pattern.permute.xlu0 %v192_v0  ;;  %v17_v1 = vld [vmem:[%s244_s1 + $0x10] sm:$0xff]  ;;  %v15_v2 = vld [vmem:[%s244_s1] sm:$0xff]  ;;  %v16_v3 = vld [vmem:[%s244_s1 + $0x8] sm:$0xff] }
   0x2   :  { %33 = vperm.xlu1 %169, %v17_v1   ;;  %23 = vperm.xlu0 %168, %v15_v2   ;;  %v18_v5 = vld [vmem:[%s244_s1 + $0x18] sm:$0xff]  ;;  %v229_v8 = vshrl.u32 %v42_v7, 7  ;;  %v20_v13 = vld [vmem:[%s245_s0] sm:$0x3]  ;;  %vm157_vm0 = vcmp.lt.s32.totalorder %v42_v7, 256 }
   0x4   :  { %v44_v9 = vsub.s32 0, %v229_v8  ;;  %v48_v12 = vsub.s32 1, %v229_v8 }
   0x6   :  { %170 = vset.pattern.permute.xlu1 %v193_v4  ;;  %28 = vperm.xlu0 %168, %v16_v3   ;;  %v45_v14 = vrot.slane %v20_v13, %v44_v9  ;;  %v49_v16 = vrot.slane %v20_v13, %v48_v12  ;;  %v134_v13 = vstv %s246_s2 }
   0x7   :  { %61 = vperm.xlu1 %170, %v15_v2  }
   0xa   :  { %171 = vset.pattern.permute.xlu0 %v193_v4 }
   0xb   :  { %172 = vset.pattern.permute.xlu1 %v192_v0  ;;  %65 = vperm.xlu0 %171, %v16_v3  }
   0xc   :  { %38 = vperm.xlu1 %172, %v18_v5  }
   0xf   :  { %73 = vperm.xlu0 %171, %v18_v5  }
  0x10   :  { %173 = vset.pattern.permute.xlu1 %v193_v4 }
  0x11   :  { %69 = vperm.xlu1 %173, %v17_v1  }
  0x13   :  { %175 = vset.pattern.permute.xlu0 %v194_v6 }
  0x14   :  { %97 = vperm.xlu0 %175, %v16_v3  }
  0x15   :  { %174 = vset.pattern.permute.xlu1 %v194_v6 }
  0x16   :  { %93 = vperm.xlu1 %174, %v15_v2  }
  0x1a   :  { %101 = vperm.xlu1 %174, %v17_v1  }
  0x1e   :  { %105 = vperm.xlu1 %174, %v18_v5   ;;  %v195_v5 = vmov 1966171168  }
  0x1f   :  { %v141_v6 = vunpack.c.l.s4 %v195_v5 }
  0x7d   :  { %v34_v10 = vpop.permute.xlu1 %33  ;;  %v24_v11 = vpop.permute.xlu0 %23 }
  0x7e   :  { %v52_v18 = vmul.f32 %v45_v14, %v24_v11  ;;  %v53_v19 = vmul.f32 %v49_v16, %v24_v11  ;;  %v56_v30 = vmul.f32 %v45_v14, %v34_v10  ;;  %v57_v32 = vmul.f32 %v49_v16, %v34_v10 }
  0x81   :  { %v29_v15 = vpop.permute.xlu0 %28 }
  0x82   :  { %v62_v17 = vpop.permute.xlu1 %61  ;;  %v54_v20 = vmul.f32 %v45_v14, %v29_v15  ;;  %v55_v21 = vmul.f32 %v49_v16, %v29_v15 }
  0x83   :  { %v76_v23 = vadd.f32 %v62_v17, %v52_v18  ;;  %v77_v27 = vadd.f32 %v62_v17, %v53_v19 }
  0x86   :  { %v66_v22 = vpop.permute.xlu0 %65 }
  0x87   :  { %v78_v24 = vadd.f32 %v66_v22, %v54_v20  ;;  %v79_v25 = vadd.f32 %v66_v22, %v55_v21  ;;  %v39_v26 = vpop.permute.xlu1 %38 }
  0x88   :  { %v58_v28 = vmul.f32 %v45_v14, %v39_v26  ;;  %v59_v29 = vmul.f32 %v49_v16, %v39_v26  ;;  %v142_v14 = vunpack.c.0.s8 %v141_v6 }
  0x89   :  { %176 = vtanh.f32 %v78_v24 }
  0x8a   :  { %178 = vtanh.f32 %v79_v25  ;;  %v74_v31 = vpop.permute.xlu0 %73  ;;  %v145_v19 = vsub.s32 %v142_v14, %v229_v8 }
  0x8b   :  { %180 = vtanh.f32 %v76_v23  ;;  %v82_v33 = vadd.f32 %v74_v31, %v58_v28  ;;  %v83_v34 = vadd.f32 %v74_v31, %v59_v29 }
  0x8c   :  { %182 = vtanh.f32 %v77_v27  ;;  %v70_v35 = vpop.permute.xlu1 %69 }
  0x8d   :  { %184 = vtanh.f32 %v82_v33  ;;  %v80_v36 = vadd.f32 %v70_v35, %v56_v30  ;;  %v81_v37 = vadd.f32 %v70_v35, %v57_v32 }
  0x8e   :  { %186 = vtanh.f32 %v83_v34 }
  0x8f   :  { %188 = vtanh.f32 %v80_v36  ;;  %v98_v41 = vpop.permute.xlu0 %97 }
  0x90   :  { %190 = vtanh.f32 %v81_v37 }
  0x91   :  { %v94_v38 = vpop.permute.xlu1 %93 }
  0x95   :  { %v102_v40 = vpop.permute.xlu1 %101 }
  0x96   :  { %v177_v39 = vpop.eup %176 }
  0x97   :  { %v179_v42 = vpop.eup %178  ;;  %v110_v45 = vmul.f32 %v177_v39, %v98_v41 }
  0x98   :  { %v181_v43 = vpop.eup %180  ;;  %v111_v47 = vmul.f32 %v179_v42, %v98_v41 }
  0x99   :  { %v183_v44 = vpop.eup %182  ;;  %v108_v49 = vmul.f32 %v181_v43, %v94_v38  ;;  %v106_v52 = vpop.permute.xlu1 %105 }
  0x9a   :  { %v185_v46 = vpop.eup %184  ;;  %v109_v51 = vmul.f32 %v183_v44, %v94_v38 }
  0x9b   :  { %v187_v48 = vpop.eup %186  ;;  %v116_v55 = vadd.f32 %v110_v45, %v108_v49  ;;  %v114_v58 = vmul.f32 %v185_v46, %v106_v52 }
  0x9c   :  { %v189_v50 = vpop.eup %188  ;;  %v125_v57 = vadd.f32 %v111_v47, %v109_v51  ;;  %v115_v60 = vmul.f32 %v187_v48, %v106_v52 }
  0x9d   :  { %v191_v53 = vpop.eup %190  ;;  %v112_v54 = vmul.f32 %v189_v50, %v102_v40 }
  0x9e   :  { %v113_v56 = vmul.f32 %v191_v53, %v102_v40 }
  0x9f   :  { %v117_v59 = vadd.f32 %v116_v55, %v112_v54 }
  0xa0   :  { %v126_v61 = vadd.f32 %v125_v57, %v113_v56 }
  0xa1   :  { %v118_v62 = vadd.f32 %v117_v59, %v114_v58 }
  0xa2   :  { %v127_v63 = vadd.f32 %v126_v61, %v115_v60 }
  0xa3   :  { %v119_v0 = vrot.slane %v118_v62, 4 }
  0xa4   :  { %v128_v1 = vrot.slane %v127_v63, 4 }
  0xa5   :  { %v120_v2 = vadd.f32 %v119_v0, %v118_v62 }
  0xa6   :  { %v129_v3 = vadd.f32 %v128_v1, %v127_v63 }
  0xa7   :  { %v121_v4 = vrot.slane %v120_v2, 2 }
  0xa8   :  { %v130_v9 = vrot.slane %v129_v3, 2 }
  0xa9   :  { %v122_v10 = vadd.f32 %v121_v4, %v120_v2 }
  0xaa   :  { %v131_v11 = vadd.f32 %v130_v9, %v129_v3 }
  0xab   :  { %v123_v12 = vrot.slane %v122_v10, 1 }
  0xac   :  { %v132_v15 = vrot.slane %v131_v11, 1 }
  0xad   :  { %v124_v16 = vadd.f32 %v123_v12, %v122_v10 }
  0xae   :  { %v133_v17 = vadd.f32 %v132_v15, %v131_v11 }
  0xaf   :  { %v135_v18 = vadd.f32 %v134_v13, %v124_v16 }
  0xb0   :  { %v136_v20 = vadd.f32 %v134_v13, %v133_v17 }
  0xb2   :  { %v139_v21 = vcombine.low %v135_v18, %v136_v20 }
  0xb4   :  { %v146_v22 = vrot.slane %v139_v21, %v145_v19 }
  0xb6   :  { %v153_v23 = vrot.slane %v146_v22, %v145_v19 }
  0xb8   :  { %159 = vst.msk [vmem:[%s247_s3] sm:$0x3] %vm157_vm0, %v153_v23 }

</bundles_post_ra>
